<compile_context>
chip_gen: v7x
topology: tpu7x:2x2x1
jax: 0.10.0
libtpu: 0.0.40
codegen_flags: <defaults>
</compile_context>

<pallas_src>
import functools

import jax
import jax.numpy as jnp
from jax.experimental import pallas as pl
from jax.experimental.pallas import tpu as pltpu


def _round_up(x, m):
    return ((x + m - 1) // m) * m


def _vmem_capacity_bytes():
    """Per-core VMEM capacity, with a conservative fallback (v7x = 64 MiB/TC)."""
    try:
        info = pltpu.get_tpu_info()
        cap = int(getattr(info, "vmem_capacity_bytes", 0) or 0)
        if cap > 0:
            return cap
    except Exception:
        pass
    return 64 * 1024 * 1024


def _pick_batch_tile(n):
    """Largest divisor of n that is <= 8, shrunk so the parallel (batch) grid
    axis has >= 2 programs whenever n >= 2 (v7x megacore sharding)."""
    tn = max(d for d in range(1, min(n, 8) + 1) if n % d == 0)
    while n // tn < 2 and tn > 1:
        tn = max(d for d in range(1, tn) if n % d == 0)
    return tn


def _sublane_pad(c, itemsize):
    # Second-to-last dim pads to 8 (32-bit) / 16 (16-bit) / 32 (8-bit) rows.
    return _round_up(c, 8 * max(1, 4 // itemsize))


def _excite(pooled, w1_ref, b1_ref, w2_ref, b2_ref):
    """pooled (TN, C) -> fc1 -> ReLU -> fc2 -> (TN, C), all in f32."""
    h = jnp.dot(pooled, w1_ref[...], preferred_element_type=jnp.float32) + b1_ref[...]
    h = jnp.maximum(h, 0.0)
    return jnp.dot(h, w2_ref[...], preferred_element_type=jnp.float32) + b2_ref[...]


def _se_kernel_single(x_ref, w1_ref, b1_ref, w2_ref, b2_ref, o_ref, *, inv_hw):
    """1-D grid over batch tiles; the block holds the full spatial extent."""
    pooled = jnp.sum(x_ref[...], axis=-1, dtype=jnp.float32) * inv_hw     # (TN, C)
    out = _excite(pooled, w1_ref, b1_ref, w2_ref, b2_ref)
    o_ref[...] = out[:, None, :].astype(o_ref.dtype)


def _se_kernel_multi(x_ref, w1_ref, b1_ref, w2_ref, b2_ref, o_ref, acc_ref, *,
                     inv_hw, rem_lanes, needs_mask):
    """2-D grid (batch tiles, spatial-reduction tiles); f32 scratch accumulator."""
    j = pl.program_id(1)
    nj = pl.num_programs(1)

    @pl.when(j == 0)
    def _init():
        acc_ref[...] = jnp.zeros_like(acc_ref)

    def _accum_full():
        acc_ref[...] += jnp.sum(x_ref[...], axis=-1, dtype=jnp.float32)

    def _finalize():
        pooled = acc_ref[...] * inv_hw
        out = _excite(pooled, w1_ref, b1_ref, w2_ref, b2_ref)
        o_ref[...] = out[:, None, :].astype(o_ref.dtype)

    if needs_mask:
        # Full tiles: plain load + sum (no masking cost in the steady state).
        @pl.when(j < nj - 1)
        def _full():
            _accum_full()

        # Last tile: its out-of-range lanes are undefined -> select (not mul).
        @pl.when(j == nj - 1)
        def _tail():
            xv = x_ref[...]
            lane = jax.lax.broadcasted_iota(jnp.int32, xv.shape, 2)
            xm = jnp.where(lane < rem_lanes, xv, jnp.zeros_like(xv))
            acc_ref[...] += jnp.sum(xm, axis=-1, dtype=jnp.float32)
            _finalize()
    else:
        _accum_full()

        @pl.when(j == nj - 1)
        def _last():
            _finalize()


def se_net_forward(x_nchw, w1, b1, w2, b2, *, x_vmem_budget_bytes=None):
    """SE_net forward: AdaptiveAvgPool2d(1) -> 1x1 conv -> ReLU -> 1x1 conv.

    x_nchw: (N, C, H, W); w1: (Cr, C); b1: (Cr,); w2: (C, Cr); b2: (C,).
    Returns (N, C, 1, 1), matching the PyTorch module.
    """
    N, C, H, W = x_nchw.shape
    Cr = w1.shape[0]
    HW = H * W
    itemsize = jnp.dtype(x_nchw.dtype).itemsize

    # ---- Hardware-derived VMEM budget --------------------------------------
    vmem_cap = _vmem_capacity_bytes()
    if x_vmem_budget_bytes is None:
        # Total budget for the double-buffered x window; leave headroom for the
        # resident weights, output buffers, scratch and compiler scratch.
        x_vmem_budget_bytes = min(int(vmem_cap * 0.7), 48 * 1024 * 1024)

    TN = _pick_batch_tile(N)
    c_pad = _sublane_pad(C, itemsize)
    per_buf = max(x_vmem_budget_bytes // 2, 128 * 128 * itemsize)

    full_block_bytes = TN * c_pad * _round_up(HW, 128) * itemsize
    single_step = full_block_bytes <= per_buf
    thw = HW

    if not single_step:
        # Streaming path: ~<=8 MiB per pipeline buffer already sits at the HBM
        # roofline; larger tiles only add VMEM pressure.
        stream_buf = min(per_buf, 8 * 1024 * 1024)
        thw = (stream_buf // (TN * c_pad * itemsize)) // 128 * 128
        thw = max(128, min(thw, _round_up(HW, 128)))
        if thw >= HW:                      # degenerate: one block covers all of HW
            single_step = True
            thw = HW

    # Contiguous (N, C, H*W) view; merging trailing dims is a free reshape.
    x_flat = x_nchw.reshape(N, C, HW)

    # Matmul-friendly weight layouts: pooled @ w1.T, h @ w2.T  (f32 for accuracy).
    w1_t = jnp.transpose(w1).astype(jnp.float32)       # (C, Cr)
    w2_t = jnp.transpose(w2).astype(jnp.float32)       # (Cr, C)
    b1_2d = b1.reshape(1, Cr).astype(jnp.float32)
    b2_2d = b2.reshape(1, C).astype(jnp.float32)

    inv_hw = 1.0 / float(HW)
    n_tiles = N // TN

    cost = pl.CostEstimate(
        flops=int(N * C * HW + 4 * N * C * Cr),
        transcendentals=0,
        bytes_accessed=int(N * C * HW * itemsize
                           + (2 * C * Cr + C + Cr) * 4
                           + N * C * itemsize),
    )

    if single_step:
        x_block_bytes = TN * c_pad * _round_up(HW, 128) * itemsize
        kernel = functools.partial(_se_kernel_single, inv_hw=inv_hw)
        grid = (n_tiles,)
        in_specs = [
            pl.BlockSpec((TN, C, HW), lambda i: (i, 0, 0)),
            pl.BlockSpec((C, Cr), lambda i: (0, 0)),     # resident (constant index)
            pl.BlockSpec((1, Cr), lambda i: (0, 0)),
            pl.BlockSpec((Cr, C), lambda i: (0, 0)),
            pl.BlockSpec((1, C), lambda i: (0, 0)),
        ]
        out_specs = pl.BlockSpec((TN, 1, C), lambda i: (i, 0, 0))
        scratch_shapes = []
        dim_sem = ("parallel",)
    else:
        n_hw = pl.cdiv(HW, thw)
        rem_lanes = HW - (n_hw - 1) * thw
        needs_mask = (HW % thw) != 0
        x_block_bytes = TN * c_pad * thw * itemsize
        kernel = functools.partial(_se_kernel_multi, inv_hw=inv_hw,
                                   rem_lanes=rem_lanes, needs_mask=needs_mask)
        grid = (n_tiles, n_hw)
        in_specs = [
            pl.BlockSpec((TN, C, thw), lambda i, j: (i, 0, j)),
            pl.BlockSpec((C, Cr), lambda i, j: (0, 0)),
            pl.BlockSpec((1, Cr), lambda i, j: (0, 0)),
            pl.BlockSpec((Cr, C), lambda i, j: (0, 0)),
            pl.BlockSpec((1, C), lambda i, j: (0, 0)),
        ]
        out_specs = pl.BlockSpec((TN, 1, C), lambda i, j: (i, 0, 0))
        scratch_shapes = [pltpu.VMEM((TN, C), jnp.float32)]
        dim_sem = ("parallel", "arbitrary")

    # Explicit scoped-VMEM limit: cover the double-buffered x window plus
    # headroom, never exceeding the chip's physical per-core VMEM.
    vmem_limit = int(min(vmem_cap, max(2 * x_block_bytes + (8 << 20), 32 << 20)))

    out = pl.pallas_call(
        kernel,
        out_shape=jax.ShapeDtypeStruct((N, 1, C), x_nchw.dtype),
        grid=grid,
        in_specs=in_specs,
        out_specs=out_specs,
        scratch_shapes=scratch_shapes,
        compiler_params=pltpu.CompilerParams(
            dimension_semantics=dim_sem,
            vmem_limit_bytes=vmem_limit),
        cost_estimate=cost,
    )(x_flat, w1_t, b1_2d, w2_t, b2_2d)

    return out.reshape(N, C, 1, 1)


def _reference(x_nchw, w1, b1, w2, b2):
    pooled = jnp.mean(x_nchw.astype(jnp.float32), axis=(2, 3))           # (N, C)
    h = jnp.maximum(pooled @ w1.T + b1, 0.0)                             # (N, Cr)
    out = h @ w2.T + b2                                                  # (N, C)
    return out.reshape(x_nchw.shape[0], -1, 1, 1).astype(x_nchw.dtype)


if __name__ == "__main__":
    key = jax.random.PRNGKey(0)
    reduction = 16

    # --- Case 1: small shapes; exercises the collapsed single-step path ----
    N, C, H, W = 2, 32, 16, 16
    Cr = C // reduction
    kx, k1, kb1, k2, kb2, key = jax.random.split(key, 6)
    x = jax.random.normal(kx, (N, C, H, W), dtype=jnp.float32)
    w1 = jax.random.normal(k1, (Cr, C), dtype=jnp.float32) * 0.1      # fc1.weight (Cr, C, 1, 1)
    b1 = jax.random.normal(kb1, (Cr,), dtype=jnp.float32) * 0.1       # fc1.bias
    w2 = jax.random.normal(k2, (C, Cr), dtype=jnp.float32) * 0.1      # fc2.weight (C, Cr, 1, 1)
    b2 = jax.random.normal(kb2, (C,), dtype=jnp.float32) * 0.1        # fc2.bias

    out = jax.block_until_ready(se_net_forward(x, w1, b1, w2, b2))
    ref = _reference(x, w1, b1, w2, b2)
    assert out.shape == (N, C, 1, 1), out.shape
    assert jnp.allclose(out, ref, atol=1e-5, rtol=1e-5), float(jnp.max(jnp.abs(out - ref)))

    # --- Case 2: forced-small VMEM budget -> multi-step spatial reduction
    #     with in-kernel tail masking (HW=400 -> 4 blocks of 128 lanes, last
    #     block keeps only 16 valid lanes), 2 programs on the batch axis. ----
    N2, C2, H2, W2 = 8, 64, 20, 20
    Cr2 = C2 // reduction
    kx, k1, kb1, k2, kb2, key = jax.random.split(key, 6)
    x2 = jax.random.normal(kx, (N2, C2, H2, W2), dtype=jnp.float32)
    w1b = jax.random.normal(k1, (Cr2, C2), dtype=jnp.float32) * 0.1
    b1b = jax.random.normal(kb1, (Cr2,), dtype=jnp.float32) * 0.1
    w2b = jax.random.normal(k2, (C2, Cr2), dtype=jnp.float32) * 0.1
    b2b = jax.random.normal(kb2, (C2,), dtype=jnp.float32) * 0.1

    out2 = jax.block_until_ready(
        se_net_forward(x2, w1b, b1b, w2b, b2b, x_vmem_budget_bytes=256 * 1024))
    ref2 = _reference(x2, w1b, b1b, w2b, b2b)
    assert out2.shape == (N2, C2, 1, 1), out2.shape
    assert jnp.allclose(out2, ref2, atol=1e-4, rtol=1e-4), float(jnp.max(jnp.abs(out2 - ref2)))

    # --- Case 3: same shapes, default hardware-derived budget (single-step) -
    out3 = jax.block_until_ready(se_net_forward(x2, w1b, b1b, w2b, b2b))
    assert jnp.allclose(out3, ref2, atol=1e-4, rtol=1e-4), float(jnp.max(jnp.abs(out3 - ref2)))

    print("KERNEL_OK")
</pallas_src>

<mosaic_0001>
module attributes {stable_mosaic.version = 11 : i64} {
  func.func @_se_kernel_single(%arg0: i32, %arg1: memref<1x32x256xf32, #tpu.memory_space<vmem>>, %arg2: memref<32x2xf32, #tpu.memory_space<vmem>>, %arg3: memref<1x2xf32, #tpu.memory_space<vmem>>, %arg4: memref<2x32xf32, #tpu.memory_space<vmem>>, %arg5: memref<1x32xf32, #tpu.memory_space<vmem>>, %arg6: memref<1x1x32xf32, #tpu.memory_space<vmem>>) attributes {dimension_semantics = [#tpu.dimension_semantics<parallel>], iteration_bounds = array<i64: 2>, scalar_prefetch = 0 : i64, scratch_operands = 0 : i64, tpu.core_type = #tpu.core_type<tc>, window_params = [{transform_indices = @transform_0, window_bounds = array<i64: 1, 32, 256>}, {pipeline_mode = #tpu.pipeline_mode<synchronous>, transform_indices = @transform_1, window_bounds = array<i64: 32, 2>}, {pipeline_mode = #tpu.pipeline_mode<synchronous>, transform_indices = @transform_2, window_bounds = array<i64: 1, 2>}, {pipeline_mode = #tpu.pipeline_mode<synchronous>, transform_indices = @transform_3, window_bounds = array<i64: 2, 32>}, {pipeline_mode = #tpu.pipeline_mode<synchronous>, transform_indices = @transform_4, window_bounds = array<i64: 1, 32>}, {transform_indices = @transform_5, window_bounds = array<i64: 1, 1, 32>}]} {
    %c0 = arith.constant 0 : index
    %c0_0 = arith.constant 0 : index
    %c0_1 = arith.constant 0 : index
    %0 = vector.load %arg1[%c0, %c0_0, %c0_1] : memref<1x32x256xf32, #tpu.memory_space<vmem>>, vector<1x32x256xf32>
    %cst = arith.constant dense<0.000000e+00> : vector<1x32xf32>
    %1 = vector.multi_reduction <add>, %0, %cst [2] : vector<1x32x256xf32> to vector<1x32xf32>
    %cst_2 = arith.constant 3.906250e-03 : f32
    %2 = vector.broadcast %cst_2 : f32 to vector<1x32xf32>
    %3 = arith.mulf %1, %2 : vector<1x32xf32>
    %c0_3 = arith.constant 0 : index
    %c0_4 = arith.constant 0 : index
    %4 = vector.load %arg2[%c0_3, %c0_4] : memref<32x2xf32, #tpu.memory_space<vmem>>, vector<32x2xf32>
    %cst_5 = arith.constant dense<0.000000e+00> : vector<1x2xf32>
    %5 = tpu.matmul %3, %4, %cst_5 {dimension_numbers = #tpu.dot_dimension_numbers<[1], [0], [0], [1], [0, 0, 1, 1], [], []>} : vector<1x32xf32>, vector<32x2xf32>, vector<1x2xf32> -> vector<1x2xf32>
    %c0_6 = arith.constant 0 : index
    %c0_7 = arith.constant 0 : index
    %6 = vector.load %arg3[%c0_6, %c0_7] : memref<1x2xf32, #tpu.memory_space<vmem>>, vector<1x2xf32>
    %7 = arith.addf %5, %6 : vector<1x2xf32>
    %cst_8 = arith.constant 0.000000e+00 : f32
    %8 = vector.broadcast %cst_8 : f32 to vector<1x2xf32>
    %9 = arith.maximumf %7, %8 : vector<1x2xf32>
    %c0_9 = arith.constant 0 : index
    %c0_10 = arith.constant 0 : index
    %10 = vector.load %arg4[%c0_9, %c0_10] : memref<2x32xf32, #tpu.memory_space<vmem>>, vector<2x32xf32>
    %cst_11 = arith.constant dense<0.000000e+00> : vector<1x32xf32>
    %11 = tpu.matmul %9, %10, %cst_11 {dimension_numbers = #tpu.dot_dimension_numbers<[1], [0], [0], [1], [0, 0, 1, 1], [], []>} : vector<1x2xf32>, vector<2x32xf32>, vector<1x32xf32> -> vector<1x32xf32>
    %c0_12 = arith.constant 0 : index
    %c0_13 = arith.constant 0 : index
    %12 = vector.load %arg5[%c0_12, %c0_13] : memref<1x32xf32, #tpu.memory_space<vmem>>, vector<1x32xf32>
    %13 = arith.addf %11, %12 : vector<1x32xf32>
    %14 = vector.shape_cast %13 : vector<1x32xf32> to vector<1x1x32xf32>
    %c0_14 = arith.constant 0 : index
    %c0_15 = arith.constant 0 : index
    %c0_16 = arith.constant 0 : index
    %15 = vector.load %arg6[%c0_14, %c0_15, %c0_16] : memref<1x1x32xf32, #tpu.memory_space<vmem>>, vector<1x1x32xf32>
    tpu.vector_store %arg6[%c0_14, %c0_15, %c0_16], %14 {strides = array<i32>} : memref<1x1x32xf32, #tpu.memory_space<vmem>>, vector<1x1x32xf32>,
    return
  }
  func.func @transform_0(%arg0: i32) -> (i32, i32, i32) {
    %c0_i32 = arith.constant 0 : i32
    %c0_i32_0 = arith.constant 0 : i32
    %c0_i32_1 = arith.constant 0 : i32
    return %arg0, %c0_i32, %c0_i32_0 : i32, i32, i32
  }
  func.func @transform_1(%arg0: i32) -> (i32, i32) {
    %c0_i32 = arith.constant 0 : i32
    %c0_i32_0 = arith.constant 0 : i32
    %c0_i32_1 = arith.constant 0 : i32
    return %c0_i32, %c0_i32_0 : i32, i32
  }
  func.func @transform_2(%arg0: i32) -> (i32, i32) {
    %c0_i32 = arith.constant 0 : i32
    %c0_i32_0 = arith.constant 0 : i32
    %c0_i32_1 = arith.constant 0 : i32
    return %c0_i32, %c0_i32_0 : i32, i32
  }
  func.func @transform_3(%arg0: i32) -> (i32, i32) {
    %c0_i32 = arith.constant 0 : i32
    %c0_i32_0 = arith.constant 0 : i32
    %c0_i32_1 = arith.constant 0 : i32
    return %c0_i32, %c0_i32_0 : i32, i32
  }
  func.func @transform_4(%arg0: i32) -> (i32, i32) {
    %c0_i32 = arith.constant 0 : i32
    %c0_i32_0 = arith.constant 0 : i32
    %c0_i32_1 = arith.constant 0 : i32
    return %c0_i32, %c0_i32_0 : i32, i32
  }
  func.func @transform_5(%arg0: i32) -> (i32, i32, i32) {
    %c0_i32 = arith.constant 0 : i32
    %c0_i32_0 = arith.constant 0 : i32
    %c0_i32_1 = arith.constant 0 : i32
    return %arg0, %c0_i32, %c0_i32_0 : i32, i32, i32
  }
}

</mosaic_0001>

<bundles_post_ra>
// kernel: tpu_custom_call.1
= control target key start
LH: loop header
LB: loop body
LE: loop exit
PB: predicated region body
PF: predicated region fallthrough
CT: control target
= control target key end

     0   :  { %10 = vsyncpa [#allocation3], 0  ;;  %s949_s0 = inlined_call_operand.hbm [shape: f32[2,32,256], index: 0, kind: input, shape index: {}]   ;;  %s950_s1 = inlined_call_operand.vmem [shape: f32[32,2], index: 1, kind: input, shape index: {}]   ;;  %s951_s2 = inlined_call_operand.vmem [shape: f32[1,2], index: 2, kind: input, shape index: {}]   ;;  %s952_s3 = inlined_call_operand.vmem [shape: f32[2,32], index: 3, kind: input, shape index: {}]   ;;  %s953_s4 = inlined_call_operand.vmem [shape: f32[1,32], index: 4, kind: input, shape index: {}]   ;;  %s954_s5 = inlined_call_operand.hbm [shape: f32[2,1,32], index: 5, kind: output, shape index: {}]  }
   0x1   :  { %12 = vsyncpa [#allocation3 + $0x1], 0 }
   0x2   :  { %13 = vsyncpa [#allocation4], 0 }
   0x3   :  { %15 = vsyncpa [#allocation4 + $0x1], 0  ;;  %s767_s18 = smov 0   ;;  %s769_s19 = smov 0  }
   0x4   :  { %s771_s20 = smov 0   ;;  %s773_s21 = smov 0  }
   0x5 LB: > { %s788_s22 = sadd.s32 4294967295, %s728_s21   ;;  %s537_s23 = sadd.s32 4294967294, %s728_s21   ;;  %s728_s21 = sphi %s773_s21, %s967_s21   ;;  %s724_s20 = sphi %s771_s20, %s966_s20   ;;  %s720_s19 = sphi %s769_s19, %s965_s19   ;;  %s716_s18 = sphi %s767_s18, %s964_s18  }
   0x6   : > { %s792_s24 = sadd.s32 1, %s728_s21   ;;  %s28_s25 = sadd.s32 1, %s724_s20 }
   0x7   : > { %s25_s26 = ssub.s32 %s728_s21, %s792_s24  ;;  %p35_p0 = scmp.ne.s32.totalorder %s724_s20, %s720_s19 }
   0x8   : > { %p26_p1 = scmp.eq.s32.totalorder %s25_s26, 0  ;;  %p36_p2 = scmp.eq.s32.totalorder %s728_s21, 0 }
   0x9   : > { %p41_p3 = scmp.ne.s32.totalorder %s720_s19, %s716_s18  ;;  %p42_p4 = scmp.eq.s32.totalorder %s788_s22, 0 }
   0xa   : > { %s804_s27 = scalar_select %p26_p1, %s724_s20, %s28_s25  }
   0xb   : > { %p806_p5 = por %p36_p2, %p35_p0  ;;  %p810_p6 = por %p42_p4, %p41_p3 }
   0xc   : > { %p149_p7 = scmp.eq.s32.totalorder %s788_s22, 1  ;;  %p155_p8 = scmp.eq.s32.totalorder %s537_s23, 1 }
   0xd   : > { %p593_p10 = scmp.lt.s32.totalorder %s728_s21, 2  ;;  %s187_s7 = sand.u32 1, %s724_s20  }
   0xe   : > { %p817_p11 = por %p149_p7, %p35_p0  ;;  %p821_p12 = por %p155_p8, %p41_p3 }
   0xf   : > { %s551_s8 = sshll.u32 %s728_s21, 10  ;;  %s540_s9 = sshll.u32 %s187_s7, 6 }
  0x10   : > { %s958_s30 = scalar_select %p817_p11, 1, 0 }
  0x11   : > { %s959_s6 = scalar_select %p821_p12, 1, 0 }
  0x12   : > { %s830_s12 = scalar_lea.hbm %s949_s0, %s551_s8  ;;  %s191_s13 = scalar_lea.vmem [#allocation2], %s540_s9 }
  0x13   : > { %s198_s14 = sshll.u32 %s191_s13, 4  ;;  %p834_p13 = pnand %p593_p10, %p806_p5  ;;  %s838_s14 = int_to_ptr.vmem [resolvable:$true] %s198_s14 }
  0x14   : > { %s840_s16 = scalar_lea.sflag [#allocation3], %s187_s7  ;;  %s632_s17 = scalar_lea.hbm %s830_s12, 1024 }
  0x15   : > { %p633_p0 = scmp.ne.s32.totalorder %s830_s12, %s632_s17  ;;  %p634_p1 = pneg %p834_p13 }
  0x16   : > { %s637_s26 = scalar_lea.hbm %s949_s0, 2048  ;;  %p638_p4 = scmp.lt.u32.totalorder %s830_s12, %s949_s0 }
  0x17   : > { %p635_p2 = pnand %p634_p1, %p633_p0  ;;  %p639_p5 = scmp.lt.u32.totalorder %s637_s26, %s632_s17 }
  0x18   : > { %p641_p8 = scmp.lt.u32.totalorder %s632_s17, %s830_s12 }
  0x19   : > { %p636_p3 = pneg %p635_p2  ;;  %p640_p7 = por %p639_p5, %p638_p4 }
  0x1b   : > { %p642_p10 = por %p641_p8, %p640_p7 }
  0x1d   : > { %p643_p9 = pnand %p642_p10, %p636_p3 }
  0x1f   : > { %646 = shalt.err (!%p643_p9)
}
  0x20   : > { %s647_s7 = scalar_lea.vmem %s838_s14, 1024  ;;  %s730_s9 = smov [#allocation2]  }
  0x21   : > { %p648_p0 = scmp.ne.s32.totalorder %s838_s14, %s647_s7  ;;  %s652_s10 = sshll.u32 %s730_s9, 4  ;;  %s653_s10 = int_to_ptr.vmem [resolvable:$false] %s652_s10 }
  0x22   : > { %s654_s11 = scalar_lea.vmem %s653_s10, 2048  ;;  %p655_p11 = scmp.lt.s32.totalorder %s838_s14, %s653_s10 }
  0x23   : > { %p650_p2 = pnand %p648_p0, %p634_p1  ;;  %p656_p4 = scmp.lt.s32.totalorder %s654_s11, %s647_s7 }
  0x25   : > { %p651_p12 = pneg %p650_p2  ;;  %p657_p5 = por %p656_p4, %p655_p11 }
  0x27   : > { %p658_p7 = pnand %p657_p5, %p651_p12 }
  0x29   : > { %661 = shalt.err (!%p658_p7)
}
  0x2a   : > { %s731_s13 = smov 256   ;;  %s732_s17 = smov 16  }
  0x2b   : > { %588 = dma.hbm_to_vmem [thread:$0]  (!%p834_p13), %s830_s12, 1024, %s838_s14, %s840_s16, %s731_s13, %s731_s13, %s732_s17  }
  0x2c   : > { %p543_p9 = scmp.ge.s32.totalorder %s728_s21, 1  ;;  %p206_p1 = scmp.lt.s32.totalorder %s728_s21, 3 }
  0x2e   : > { %p207_p3 = pnand %p543_p9, %p206_p1 }
  0x2f   : > { %s871_s23 = sand.u32 (!%p207_p3), 1, %s720_s19  }
  0x30   : > { %210 = sbr.rel (%p207_p3) target bundleno = 656 (0x290), region = 40  ;;  %s544_s25 = sshll.u32 (!%p207_p3), %s871_s23, 6 }
  0x31   : > { %s213_s26 = scalar_lea.sflag (!%p207_p3), [#allocation3], %s871_s23  ;;  %s216_s28 = scalar_lea.vmem (!%p207_p3), [#allocation2], %s544_s25 }
  0x37   : > { %707 = dma.done.wait (%p810_p6), %s213_s26, 1024  }
  0x38   : > { %709 = vsyncadd (%p810_p6), %s213_s26, 4294966272  ;;  %v242_v0 = vld [vmem:[%s216_s28] sm:$0xff]  ;;  %v243_v1 = vld [vmem:[%s216_s28 + $0x8] sm:$0xff]  ;;  %v733_v15 = vmov 0.0|0.0   ;;  %vm734_vm0 = vmmov 0   ;;  %v735_v19 = vmov 0.0   ;;  %v275_v20 = vlaneseq }
  0x39   : > { %v246_v2 = vld [vmem:[%s216_s28 + $0x20] sm:$0xff]  ;;  %v250_v3 = vadd.f32 %v243_v1, %v242_v0  ;;  %v247_v4 = vld [vmem:[%s216_s28 + $0x28] sm:$0xff]  ;;  %v244_v5 = vld [vmem:[%s216_s28 + $0x10] sm:$0xff]  ;;  %575 = vmatprep.subr.bf16.mxu0 %v733_v15  ;;  %567 = vmatprep.mubr.msk.f32.mxu0 %vm734_vm0, %v735_v19  ;;  %vm286_vm1 = vcmask 130112   ;;  %vm293_vm2 = vcmask 195712   ;;  %vm300_vm3 = vcmask 261312  }
  0x3a   : > { %v245_v6 = vld [vmem:[%s216_s28 + $0x18] sm:$0xff]  ;;  %v256_v7 = vadd.f32 %v247_v4, %v246_v2  ;;  %v248_v8 = vld [vmem:[%s216_s28 + $0x30] sm:$0xff]  ;;  %v266_v12 = vld [vmem:[%s950_s1] sm:$0xff]  ;;  %570 = vmatprep.subr.mxu1 %v735_v19  ;;  %572 = vmatprep.mubr.msk.f32.mxu1 %vm734_vm0, %v735_v19  ;;  %v276_v21 = vand.u32 127, %v275_v20  ;;  %v278_v22 = vshrl.u32 %v275_v20, 7  ;;  %vm302_vm4 = vcmask 261120  }
  0x3b   : > { %v249_v9 = vld [vmem:[%s216_s28 + $0x38] sm:$0xff]  ;;  %251 = vadd.xlane.f32.xlu0 %v250_v3  ;;  %v253_v10 = vadd.f32 %v245_v6, %v244_v5  ;;  %v267_v13 = vld [vmem:[%s950_s1 + $0x8] sm:$0xff]  ;;  %v268_v16 = vld [vmem:[%s950_s1 + $0x10] sm:$0xff]  ;;  %vm382_vm5 = vcmask 1041408   ;;  %vm378_vm6 = vcmask 15360   ;;  %s548_s28 = sshll.u32 %s788_s22, 4 }
  0x3c   : > { %257 = vadd.xlane.f32.xlu1 %v256_v7  ;;  %v259_v11 = vadd.f32 %v249_v9, %v248_v8  ;;  %v576_v14 = vpack.c.bf16 %v267_v13, %v266_v12  ;;  %v269_v17 = vld [vmem:[%s950_s1 + $0x18] sm:$0xff]  ;;  %v281_v23 = vadd.s32 4294967288, %v276_v21  ;;  %v288_v25 = vadd.s32 4294967280, %v276_v21  ;;  %v376_v45 = vld [vmem:[%s952_s3] sm:$0x3]  ;;  %s241_s12 = scalar_lea.vmem [#allocation5], %s871_s23  ;;  %s905_s16 = scalar_lea.hbm %s954_s5, %s548_s28 }
  0x3d   : > { %v579_v18 = vpack.c.bf16 %v269_v17, %v268_v16  ;;  %v295_v26 = vadd.s32 4294967272, %v276_v21  ;;  %v279_v28 = vsub.s32 %v276_v21, %v278_v22  ;;  %571 = vmatpush3.msk.msra.mxu1 %vm382_vm5, %v376_v45  ;;  %v270_v46 = vld [vmem:[%s951_s2] sm:$0x1]  ;;  %s471_s14 = sshll.u32 %s241_s12, 4  ;;  %vm456_vm7 = vcmask 253952   ;;  %s459_s8 = scalar_lea.sflag [#allocation4], %s871_s23  ;;  %s907_s14 = int_to_ptr.vmem [resolvable:$true] %s471_s14 }
  0x3e   : > { %577 = vmatpush3.bf16.msra.mxu0 %v576_v14  ;;  %v284_v30 = vsub.s32 %v281_v23, %v278_v22  ;;  %v291_v31 = vsub.s32 %v288_v25, %v278_v22  ;;  %v377_v51 = vld [vmem:[%s953_s4] sm:$0x1]  ;;  %s662_s7 = scalar_lea.vmem %s907_s14, 16  ;;  %p961_p11 = scmp.ne.s32.totalorder %s958_s30, 0 }
  0x3f   : > { %254 = vadd.xlane.f32.xlu0 %v253_v10  ;;  %578 = vmatprep.subr.bf16.mxu0 %v733_v15  ;;  %v298_v34 = vsub.s32 %v295_v26, %v278_v22  ;;  %p663_p6 = scmp.ne.s32.totalorder %s907_s14, %s662_s7  ;;  %s736_s22 = smov [#allocation5]  }
  0x40   : > { %260 = vadd.xlane.f32.xlu1 %v259_v11  ;;  %s666_s9 = sshll.u32 %s736_s22, 4  ;;  %s667_s9 = int_to_ptr.vmem [resolvable:$false] %s666_s9 }
  0x41   : > { %p664_p12 = pnand %p663_p6, %p961_p11  ;;  %s668_s10 = scalar_lea.vmem %s667_s9, 32 }
  0x42   : > { %580 = vmatpush3.bf16.msra.mxu0 %v579_v18  ;;  %p669_p8 = scmp.lt.s32.totalorder %s907_s14, %s667_s9  ;;  %p670_p10 = scmp.lt.s32.totalorder %s668_s10, %s662_s7 }
  0x43   : > { %p665_p13 = pneg %p664_p12 }
  0x44   : > { %p671_p0 = por %p670_p10, %p669_p8 }
  0x46   : > { %p672_p2 = pnand %p671_p0, %p665_p13 }
  0xc8   : > { %v252_v24 = vpop.xlane.xlu0 %251 }
  0xc9   : > { %v258_v27 = vpop.xlane.xlu1 %257  ;;  %v262_v29 = vmul.f32 0.00390625, %v252_v24 }
  0xca   : > { %v264_v32 = vmul.f32 0.00390625, %v258_v27 }
  0xcb   : > { %v280_v38 = vrot.slane %v262_v29, %v279_v28 }
  0xcc   : > { %v255_v33 = vpop.xlane.xlu0 %254  ;;  %v292_v40 = vrot.slane %v264_v32, %v291_v31 }
  0xcd   : > { %v263_v35 = vmul.f32 0.00390625, %v255_v33  ;;  %v261_v36 = vpop.xlane.xlu1 %260 }
  0xce   : > { %v265_v37 = vmul.f32 0.00390625, %v261_v36 }
  0xcf   : > { %v285_v39 = vrot.slane %v263_v35, %v284_v30 }
  0xd0   : > { %v299_v41 = vrot.slane %v265_v37, %v298_v34 }
  0xd1   : > { %v287_v42 = vsel %vm286_vm1, %v285_v39, %v280_v38 }
  0xd2   : > { %v294_v43 = vsel %vm293_vm2, %v292_v40, %v287_v42 }
  0xd3   : > { %v301_v44 = vsel %vm300_vm3, %v299_v41, %v294_v43 }
  0xd4   : > { %568 = vmatmul.mubr.msk.f32.vlgmr.msra.gmra.mrb[0].mxu0 %vm302_vm4, %v301_v44 }
 0x1a7   : > { %v371_v47 = vpop.f32.mrb[0].mxu0 }
 0x1a8   : > { %v372_v48 = vadd.f32 %v371_v47, %v270_v46  ;;  %v569_v49 = vpop.f32.mrb[1].mxu0 }
 0x1aa   : > { %v375_v50 = vmax.f32 %v372_v48, 0.0 }
 0x1ac   : > { %573 = vmatmul.mubr.msk.f32.vlgmr.msra.gmra.mrb[0].mxu1 %vm378_vm6, %v375_v50 }
 0x27f   : > { %v452_v52 = vpop.f32.mrb[0].mxu1 }
 0x280   : > { %v453_v53 = vadd.f32 %v452_v52, %v377_v51  ;;  %v574_v54 = vpop.f32.mrb[1].mxu1 }
 0x282   : > { %457 = vst.msk [vmem:[%s241_s12] sm:$0x1] %vm456_vm7, %v453_v53 }
 0x283   : > { %675 = shalt.err (!%p672_p2)
}
 0x284   : > { %s676_s23 = scalar_lea.hbm %s905_s16, 16  ;;  %s680_s17 = scalar_lea.hbm %s954_s5, 32 }
 0x285   : > { %p677_p4 = scmp.ne.s32.totalorder %s905_s16, %s676_s23  ;;  %p681_p9 = scmp.lt.u32.totalorder %s905_s16, %s954_s5 }
 0x286   : > { %p682_p1 = scmp.lt.u32.totalorder %s680_s17, %s676_s23  ;;  %p684_p6 = scmp.lt.u32.totalorder %s676_s23, %s905_s16 }
 0x287   : > { %p678_p5 = pnand %p677_p4, %p961_p11 }
 0x288   : > { %p683_p3 = por %p682_p1, %p681_p9 }
 0x289   : > { %p679_p7 = pneg %p678_p5 }
 0x28a   : > { %p685_p12 = por %p684_p6, %p683_p3 }
 0x28c   : > { %p686_p13 = pnand %p685_p12, %p679_p7 }
 0x28e   : > { %689 = shalt.err (!%p686_p13)
}
 0x28f   : > { %583 = dma.vmem_to_hbm [thread:$0]  (%p961_p11), %s907_s14, 16, %s905_s16, %s459_s8  }
 0x290 PF: > { %s483_s28 = sand.u32 1, %s716_s18   ;;  %p962_p8 = scmp.ne.s32.totalorder %s959_s6, 0 }
 0x291   : > { %p963_p10 = scmp.ge.s32.totalorder %s728_s21, 2  ;;  %s484_s12 = scalar_lea.sflag [#allocation4], %s483_s28 }
 0x293   : > { %p590_p0 = pnand %p963_p10, %p962_p8 }
 0x295   : > { %711 = dma.done.wait (!%p590_p0), %s484_s12, 16  }
 0x296   : > { %713 = vsyncadd (!%p590_p0), %s484_s12, 4294967280  ;;  %p18_p2 = scmp.ge.s32.totalorder %s792_s24, 4   ;;  %s964_s18 = smov %s720_s19 }
 0x297   : > { %s965_s19 = smov %s724_s20  ;;  %s966_s20 = smov %s804_s27 }
 0x298   : > { %s967_s21 = smov %s792_s24  ;;  %20 = sbr.rel (!%p18_p2) target bundleno = 5 (0x5), region = 85 }
 0x29f   :  { %488 = vsyncpa [#allocation3], 1 }
 0x2a0   :  { %490 = vsyncpa [#allocation3 + $0x1], 1 }
 0x2a1   :  { %491 = vsyncpa [#allocation4], 1 }
 0x2a2   :  { %493 = vsyncpa [#allocation4 + $0x1], 1 }

</bundles_post_ra>
